<compile_context>
chip_gen: v7x
topology: tpu7x:2x2x1
jax: 0.10.0
libtpu: 0.0.40
codegen_flags: <defaults>
</compile_context>

<pallas_src>
import functools

import jax
import jax.numpy as jnp
from jax.experimental import pallas as pl
from jax.experimental.pallas import tpu as pltpu

F32 = jnp.float32
BF16 = jnp.bfloat16

# v7x has 64 MiB VMEM per TensorCore (v5e/v6e: 128 MiB); keep the single-K-block
# decision and the scoped-VMEM request well under that cliff.
_SINGLE_K_VMEM_BUDGET = 40 * 1024 * 1024
_VMEM_LIMIT_BYTES = 48 * 1024 * 1024


def _vmem():
    return pl.BlockSpec(memory_space=pltpu.MemorySpace.VMEM)


def _round_up(x, m):
    return (x + m - 1) // m * m


def _pick_tile(dim, mult, max_tile):
    """Return (tile, padded_dim): padded_dim % tile == 0, tile multiple of mult."""
    padded = _round_up(dim, mult)
    t = max_tile
    while t > mult and padded % t:
        t //= 2
    return min(t, padded), padded


def _pad_to(a, r, c):
    pr = r - a.shape[0]
    pc = c - a.shape[1]
    if pr or pc:
        a = jnp.pad(a, ((0, pr), (0, pc)))
    return a


# --------------------------- fused matmul kernels ----------------------------

def _epilogue(acc, scale_ref, shift_ref, res_ref, relu):
    if scale_ref is not None:
        acc = acc * scale_ref[...]
    acc = acc + shift_ref[...]
    if res_ref is not None:
        acc = acc + res_ref[...].astype(jnp.float32)
    if relu:
        acc = jnp.maximum(acc, 0.0)
    return acc


def _unpack_mm_refs(refs, has_scale, has_res):
    x_ref, w_ref = refs[0], refs[1]
    p = 2
    scale_ref = None
    if has_scale:
        scale_ref = refs[p]; p += 1
    shift_ref = refs[p]; p += 1
    res_ref = None
    if has_res:
        res_ref = refs[p]; p += 1
    return x_ref, w_ref, scale_ref, shift_ref, res_ref, refs[p:]


def _fused_mm_single_kernel(*refs, relu, has_scale, has_res):
    # Whole K in one block: no accumulator scratch, no init/finalize phases.
    x_ref, w_ref, scale_ref, shift_ref, res_ref, rest = _unpack_mm_refs(
        refs, has_scale, has_res)
    o_ref = rest[0]
    acc = jnp.dot(x_ref[...], w_ref[...], preferred_element_type=jnp.float32)
    o_ref[...] = _epilogue(acc, scale_ref, shift_ref, res_ref, relu).astype(o_ref.dtype)


def _fused_mm_ktiled_kernel(*refs, relu, has_scale, has_res):
    # Fallback for K too large for a single VMEM block.
    x_ref, w_ref, scale_ref, shift_ref, res_ref, rest = _unpack_mm_refs(
        refs, has_scale, has_res)
    o_ref, acc_ref = rest

    @pl.when(pl.program_id(2) == 0)
    def _init():
        acc_ref[...] = jnp.zeros_like(acc_ref)

    acc_ref[...] += jnp.dot(x_ref[...], w_ref[...],
                            preferred_element_type=jnp.float32)

    @pl.when(pl.program_id(2) == pl.num_programs(2) - 1)
    def _fin():
        o_ref[...] = _epilogue(acc_ref[...], scale_ref, shift_ref, res_ref,
                               relu).astype(o_ref.dtype)


def fused_matmul(x, w, shift, scale=None, res=None, relu=False, out_dtype=F32):
    """out = relu?((x @ w) * scale + shift (+ res)); bf16 operands, f32 accumulate."""
    M, K = x.shape
    _, N = w.shape
    has_scale = scale is not None
    has_res = res is not None

    tm, Mp = _pick_tile(M, 16, 256)
    tn, Np = _pick_tile(N, 128, 256)

    # Single K block whenever it fits the VMEM budget (every call in this model):
    # removes 5-9 grid steps / conv and the accumulator read-modify-write.
    Kp1 = _round_up(K, 128)
    vmem_needed = 2 * (tm * Kp1 + Kp1 * tn) * 2 + 2 * tm * tn * 4
    single_k = vmem_needed <= _SINGLE_K_VMEM_BUDGET

    if single_k:
        Kp = Kp1
        grid = (Mp // tm, Np // tn)
        x_spec = pl.BlockSpec((tm, Kp), lambda i, j: (i, 0))
        w_spec = pl.BlockSpec((Kp, tn), lambda i, j: (0, j))
        vec_spec = pl.BlockSpec((1, tn), lambda i, j: (0, j))
        mn_spec = pl.BlockSpec((tm, tn), lambda i, j: (i, j))
        kernel = functools.partial(_fused_mm_single_kernel, relu=relu,
                                   has_scale=has_scale, has_res=has_res)
        scratch = []
        semantics = ("parallel", "parallel")
    else:
        tk = 512
        Kp = _round_up(K, tk)           # pad K up to the tile, don't shrink the tile
        grid = (Mp // tm, Np // tn, Kp // tk)
        x_spec = pl.BlockSpec((tm, tk), lambda i, j, k: (i, k))
        w_spec = pl.BlockSpec((tk, tn), lambda i, j, k: (k, j))
        vec_spec = pl.BlockSpec((1, tn), lambda i, j, k: (0, j))
        mn_spec = pl.BlockSpec((tm, tn), lambda i, j, k: (i, j))
        kernel = functools.partial(_fused_mm_ktiled_kernel, relu=relu,
                                   has_scale=has_scale, has_res=has_res)
        scratch = [pltpu.VMEM((tm, tn), jnp.float32)]
        semantics = ("parallel", "parallel", "arbitrary")

    inputs = [_pad_to(x.astype(BF16), Mp, Kp),
              _pad_to(w.astype(BF16), Kp, Np)]
    in_specs = [x_spec, w_spec]
    if has_scale:
        inputs.append(_pad_to(scale.reshape(1, N).astype(F32), 1, Np))
        in_specs.append(vec_spec)
    inputs.append(_pad_to(shift.reshape(1, N).astype(F32), 1, Np))
    in_specs.append(vec_spec)
    if has_res:
        inputs.append(_pad_to(res.astype(BF16), Mp, Np))
        in_specs.append(mn_spec)

    out = pl.pallas_call(
        kernel,
        out_shape=jax.ShapeDtypeStruct((Mp, Np), out_dtype),
        grid_spec=pltpu.PrefetchScalarGridSpec(
            num_scalar_prefetch=0,
            grid=grid,
            in_specs=in_specs,
            out_specs=mn_spec,
            scratch_shapes=scratch),
        compiler_params=pltpu.CompilerParams(
            dimension_semantics=semantics,
            vmem_limit_bytes=_VMEM_LIMIT_BYTES),
    )(*inputs)
    if Mp != M or Np != N:                     # only slice when padding occurred
        out = out[:M, :N]
    return out


# --------------------------- pooling kernel ----------------------------------

def _max9_kernel(*refs):
    # bf16 max tree over the 9 shifted views; I/O is 128-lane dense.
    o_ref = refs[-1]
    acc = refs[0][...]
    for r in refs[1:-1]:
        acc = jnp.maximum(acc, r[...])
    o_ref[...] = acc


def maxpool_3x3_s2(x):
    # TODO(synk): a fully in-kernel strided 3x3/s2 max would read the source once;
    # here the 9 strided views are XLA glue feeding a single lane-dense max kernel.
    N, H, W, C = x.shape
    k, s, pad = 3, 2, 1
    OH = (H + 2 * pad - k) // s + 1
    OW = (W + 2 * pad - k) // s + 1
    xp = jnp.pad(x, ((0, 0), (pad, pad), (pad, pad), (0, 0)),
                 constant_values=-jnp.inf)
    views = [xp[:, di:di + s * OH:s, dj:dj + s * OW:s, :].reshape(N * OH * OW, C)
             for di in range(k) for dj in range(k)]
    out = pl.pallas_call(
        _max9_kernel,
        out_shape=jax.ShapeDtypeStruct((N * OH * OW, C), x.dtype),
        in_specs=[_vmem()] * 9,
        out_specs=_vmem(),
    )(*views)
    return out.reshape(N, OH, OW, C)


# --------------------------- LSTM kernel -------------------------------------

def _lstm_kernel(x_ref, wih0_ref, whh0_ref, w1_ref, b0_ref, b1_ref, o_ref):
    """Whole 2-layer LSTM in one kernel.

    x_ref:   (T*B, E) time-major embeddings.
    wih0:    (E, 4*HP)  layer-0 input weights (gate blocks padded to HP lanes).
    whh0:    (HP, 4*HP) layer-0 recurrent weights.
    w1:      (2*HP, 4*HP) = vstack([W_ih1, W_hh1]) — layer-1 dots fused.
    b0, b1:  (1, 4*HP)  biases.
    o_ref:   (B, HP)    top-layer hidden state at the last timestep.
    """
    B, HP = o_ref.shape
    T = x_ref.shape[0] // B

    # Time-invariant input projection hoisted out of the recurrence (one dot).
    gx = jnp.dot(x_ref[...].astype(BF16), wih0_ref[...],
                 preferred_element_type=F32) + b0_ref[...]

    h0 = jnp.zeros((B, HP), F32)
    c0 = jnp.zeros((B, HP), F32)
    h1 = jnp.zeros((B, HP), F32)
    c1 = jnp.zeros((B, HP), F32)

    def act(g):
        return (jax.nn.sigmoid(g[:, 0:HP]),
                jax.nn.sigmoid(g[:, HP:2 * HP]),
                jnp.tanh(g[:, 2 * HP:3 * HP]),
                jax.nn.sigmoid(g[:, 3 * HP:4 * HP]))

    # T is small and static — fully unroll so the LLO scheduler can overlap the
    # tiny MXU dots with the EUP sigmoid/tanh work.
    for t in range(T):
        g0 = gx[t * B:(t + 1) * B, :] + jnp.dot(
            h0.astype(BF16), whh0_ref[...], preferred_element_type=F32)
        i0, f0, gg0, o0 = act(g0)
        c0 = f0 * c0 + i0 * gg0
        h0 = o0 * jnp.tanh(c0)

        xh = jnp.concatenate([h0, h1], axis=1).astype(BF16)        # (B, 2*HP)
        g1 = jnp.dot(xh, w1_ref[...], preferred_element_type=F32) + b1_ref[...]
        i1, f1, gg1, o1 = act(g1)
        c1 = f1 * c1 + i1 * gg1
        h1 = o1 * jnp.tanh(c1)

    o_ref[...] = h1                      # last timestep, top layer (padded H)


# --------------------------- model plumbing (JAX glue) -----------------------

def im2col(x, k, stride, pad):
    N, H, W, C = x.shape
    OH = (H + 2 * pad - k) // stride + 1
    OW = (W + 2 * pad - k) // stride + 1
    xp = jnp.pad(x, ((0, 0), (pad, pad), (pad, pad), (0, 0))) if pad else x
    cols = [xp[:, di:di + stride * OH:stride, dj:dj + stride * OW:stride, :]
            for di in range(k) for dj in range(k)]
    cols = jnp.concatenate(cols, axis=-1)              # (N, OH, OW, k*k*C)
    return cols.reshape(N * OH * OW, k * k * C), (N, OH, OW)


def bn_scale_shift(bn, eps=1e-5):
    gamma, beta, mean, var = bn
    scale = gamma / jnp.sqrt(var + eps)
    return scale, beta - mean * scale


def conv_bn(x, w, bn, stride, pad, relu, res=None):
    """conv (im2col matmul) + folded eval-mode BatchNorm (+ residual) (+ ReLU).

    Output channels are carried padded to a multiple of 128 lanes; padded
    channels stay exactly zero (zero weight columns, zero scale/shift), so they
    are inert for downstream convs / residuals / maxpool and all stores stay
    lane-dense with no post-kernel slicing of the big activations.
    """
    k, _, ic, oc = w.shape
    cin = x.shape[-1]                                 # may exceed ic (zero channels)
    ocp = _round_up(oc, 128)
    if cin != ic or ocp != oc:
        w = jnp.pad(w, ((0, 0), (0, 0), (0, cin - ic), (0, ocp - oc)))
    cols, (N, OH, OW) = im2col(x, k, stride, pad)
    wmat = w.reshape(k * k * cin, ocp)
    scale, shift = bn_scale_shift(bn)
    if ocp != oc:
        scale = jnp.pad(scale, (0, ocp - oc))
        shift = jnp.pad(shift, (0, ocp - oc))
    res_flat = None if res is None else res.reshape(N * OH * OW, ocp)
    out = fused_matmul(cols, wmat, shift, scale=scale, res=res_flat,
                       relu=relu, out_dtype=BF16)
    return out.reshape(N, OH, OW, ocp)


def block_forward(x, p):
    out = conv_bn(x, p["conv1"], p["bn1"], p["stride"], 1, relu=True)
    if p["down_conv"] is not None:
        identity = conv_bn(x, p["down_conv"], p["down_bn"], p["stride"], 0, relu=False)
    else:
        identity = x
    # relu( bn2(conv2(out)) + identity ) fused in one kernel call
    return conv_bn(out, p["conv2"], p["bn2"], 1, 1, relu=True, res=identity)


def cnn_forward(img_nchw, p):
    x = jnp.transpose(img_nchw, (0, 2, 3, 1)).astype(BF16)   # NCHW -> NHWC
    x = conv_bn(x, p["conv1"], p["bn1"], stride=2, pad=3, relu=True)
    x = maxpool_3x3_s2(x)
    # NOTE(v7x megacore): layer3/layer4 grids have 1-2 tiles on the parallel
    # axes; at this size single-core execution is fine — step-count reduction
    # (single-K blocks) dominates.
    for name in ("layer1", "layer2", "layer3", "layer4"):
        for blk in p[name]:
            x = block_forward(x, blk)
    N, H, W, C = x.shape
    # AdaptiveAvgPool2d((1,1)) folded around the fc matmul: mean over the 4
    # spatial positions commutes with the linear layer (bias unaffected).
    fc_w, fc_b = p["fc"]
    y = fused_matmul(x.reshape(N * H * W, C), fc_w, fc_b)        # (N*H*W, hidden)
    return jnp.mean(y.reshape(N, H * W, -1), axis=1)             # (N, hidden)


def _pad_gates(w, H, HP, in_rows=None):
    """(Din, 4H) -> (Din_p, 4*HP): each gate occupies a 128-lane-aligned block."""
    din = w.shape[0]
    dp = in_rows if in_rows is not None else din
    out = jnp.zeros((dp, 4 * HP), F32)
    for g in range(4):
        out = out.at[:din, g * HP:g * HP + H].set(w[:, g * H:(g + 1) * H].astype(F32))
    return out


def _pad_gate_bias(b, H, HP):
    out = jnp.zeros((4 * HP,), F32)
    for g in range(4):
        out = out.at[g * HP:g * HP + H].set(b[g * H:(g + 1) * H].astype(F32))
    return out


def vqa_forward(img, text, params):
    img_feat = cnn_forward(img, params["cnn"])                # (B, hidden), f32

    B, T = text.shape
    emb = jnp.take(params["embedding"], text, axis=0)         # (B, T, E) — glue gather
    E = emb.shape[-1]

    wih0, whh0, b0, wih1, whh1, b1 = params["lstm"]
    H = whh0.shape[0]
    HP = 128                                                  # gate lane padding

    # Padded-gate invariant: padded lanes of h/c stay exactly zero because all
    # padded weight rows/columns and bias lanes are zero (sigmoid(0)*tanh(0)=0).
    wih0_p = _pad_gates(wih0, H, HP)                          # (E, 4*HP)
    whh0_p = _pad_gates(whh0, H, HP, in_rows=HP)              # (HP, 4*HP)
    w1_p = jnp.concatenate([_pad_gates(wih1, H, HP, in_rows=HP),
                            _pad_gates(whh1, H, HP, in_rows=HP)], axis=0)  # (2HP, 4HP)
    b0_p = _pad_gate_bias(b0, H, HP).reshape(1, 4 * HP)
    b1_p = _pad_gate_bias(b1, H, HP).reshape(1, 4 * HP)

    x_tb = emb.transpose(1, 0, 2).reshape(T * B, E)           # time-major rows

    lstm_h = pl.pallas_call(
        _lstm_kernel,
        out_shape=jax.ShapeDtypeStruct((B, HP), F32),
        in_specs=[_vmem()] * 6,
        out_specs=_vmem(),
    )(x_tb, wih0_p.astype(BF16), whh0_p.astype(BF16), w1_p.astype(BF16),
      b0_p, b1_p)
    lstm_last = lstm_h[:, :H]                                 # (B, hidden)

    feat = jnp.concatenate([img_feat, lstm_last], axis=1)     # (B, 2*hidden)

    # Merge the tiny head matmuls (regressor + MLP layer 1) into one kernel.
    reg_w, reg_b = params["regressor"]
    w1m, b1m = params["mlp1"]
    w2, b2m = params["mlp2"]
    n_reg = reg_w.shape[1]
    head_w = jnp.concatenate([reg_w, w1m], axis=1)
    head_b = jnp.concatenate([reg_b, b1m], axis=0)
    head_out = fused_matmul(feat, head_w, head_b)             # (B, 128 + proj_dim)
    regressor_output = head_out[:, :n_reg]
    h = jnp.maximum(head_out[:, n_reg:], 0.0)
    # TODO(synk): final (proj_dim -> n_classes) projection left to plain XLA —
    # a 2x32x10 matmul costs less than a pallas_call launch.
    logits = h @ w2 + b2m
    return logits, regressor_output


# --------------------------- deterministic parameters ------------------------

def make_params(key, n_classes=10, embedding_dim=32, hidden_size=64,
                proj_dim=32, vocab_size=30522):
    it = iter(jax.random.split(key, 256))

    def nk():
        return next(it)

    def conv_w(ic, oc, k):
        return 0.05 * jax.random.normal(nk(), (k, k, ic, oc), F32)

    def bn(c):
        k1, k2, k3, k4 = jax.random.split(nk(), 4)
        return (1.0 + 0.1 * jax.random.normal(k1, (c,), F32),    # gamma
                0.1 * jax.random.normal(k2, (c,), F32),          # beta
                0.1 * jax.random.normal(k3, (c,), F32),          # running mean
                1.0 + 0.1 * jax.random.uniform(k4, (c,), F32))   # running var

    def lin(din, dout):
        return (0.05 * jax.random.normal(nk(), (din, dout), F32),
                0.05 * jax.random.normal(nk(), (dout,), F32))

    def block(ic, oc, stride):
        down = (stride != 1) or (ic != oc)
        return {
            "stride": stride,
            "conv1": conv_w(ic, oc, 3),
            "bn1": bn(oc),
            "conv2": conv_w(oc, oc, 3),
            "bn2": bn(oc),
            "down_conv": conv_w(ic, oc, 1) if down else None,
            "down_bn": bn(oc) if down else None,
        }

    cnn = {
        "conv1": conv_w(3, 64, 7),
        "bn1": bn(64),
        "layer1": [block(64, 64, 1), block(64, 64, 1)],
        "layer2": [block(64, 128, 2), block(128, 128, 1)],
        "layer3": [block(128, 256, 2), block(256, 256, 1)],
        "layer4": [block(256, 512, 2), block(512, 512, 1)],
        "fc": lin(512, hidden_size),
    }

    H4 = 4 * hidden_size
    lstm = (
        0.05 * jax.random.normal(nk(), (embedding_dim, H4), F32),   # W_ih_l0^T
        0.05 * jax.random.normal(nk(), (hidden_size, H4), F32),     # W_hh_l0^T
        0.05 * jax.random.normal(nk(), (H4,), F32),                 # b_ih_l0 + b_hh_l0
        0.05 * jax.random.normal(nk(), (hidden_size, H4), F32),     # W_ih_l1^T
        0.05 * jax.random.normal(nk(), (hidden_size, H4), F32),     # W_hh_l1^T
        0.05 * jax.random.normal(nk(), (H4,), F32),                 # b_ih_l1 + b_hh_l1
    )

    return {
        "cnn": cnn,
        "embedding": 0.05 * jax.random.normal(nk(), (vocab_size, embedding_dim), F32),
        "lstm": lstm,
        "mlp1": lin(2 * hidden_size, proj_dim),
        "mlp2": lin(proj_dim, n_classes),
        "regressor": lin(2 * hidden_size, 128),
    }


if __name__ == "__main__":
    key = jax.random.PRNGKey(0)
    kp, ki, kt = jax.random.split(key, 3)

    params = make_params(kp, n_classes=10, embedding_dim=32, hidden_size=64, proj_dim=32)

    img = jax.random.normal(ki, (2, 3, 64, 64), F32)                 # NCHW, like PyTorch
    text = jax.random.randint(kt, (2, 8), 0, 30522, jnp.int32)       # (batch, seq)

    logits, reg = vqa_forward(img, text, params)
    jax.block_until_ready((logits, reg))
    assert logits.shape == (2, 10), logits.shape
    assert reg.shape == (2, 128), reg.shape
    print("KERNEL_OK")
</pallas_src>

<mosaic_0001>
module attributes {stable_mosaic.version = 11 : i64} {
  func.func @_fused_mm_single_kernel(%arg0: i32, %arg1: i32, %arg2: memref<256x256xbf16, #tpu.memory_space<vmem>>, %arg3: memref<256x128xbf16, #tpu.memory_space<vmem>>, %arg4: memref<1x128xf32, #tpu.memory_space<vmem>>, %arg5: memref<1x128xf32, #tpu.memory_space<vmem>>, %arg6: memref<256x128xbf16, #tpu.memory_space<vmem>>) attributes {dimension_semantics = [#tpu.dimension_semantics<parallel>, #tpu.dimension_semantics<parallel>], iteration_bounds = array<i64: 8, 1>, scalar_prefetch = 0 : i64, scratch_operands = 0 : i64, tpu.core_type = #tpu.core_type<tc>, window_params = [{transform_indices = @transform_0, window_bounds = array<i64: 256, 256>}, {transform_indices = @transform_1, window_bounds = array<i64: 256, 128>}, {transform_indices = @transform_2, window_bounds = array<i64: 1, 128>}, {transform_indices = @transform_3, window_bounds = array<i64: 1, 128>}, {transform_indices = @transform_4, window_bounds = array<i64: 256, 128>}]} {
    %c0 = arith.constant 0 : index
    %c0_0 = arith.constant 0 : index
    %0 = vector.load %arg2[%c0, %c0_0] : memref<256x256xbf16, #tpu.memory_space<vmem>>, vector<256x256xbf16>
    %c0_1 = arith.constant 0 : index
    %c0_2 = arith.constant 0 : index
    %1 = vector.load %arg3[%c0_1, %c0_2] : memref<256x128xbf16, #tpu.memory_space<vmem>>, vector<256x128xbf16>
    %cst = arith.constant dense<0.000000e+00> : vector<256x128xf32>
    %2 = tpu.matmul %0, %1, %cst {dimension_numbers = #tpu.dot_dimension_numbers<[1], [0], [0], [1], [0, 0, 1, 1], [], []>} : vector<256x256xbf16>, vector<256x128xbf16>, vector<256x128xf32> -> vector<256x128xf32>
    %c0_3 = arith.constant 0 : index
    %c0_4 = arith.constant 0 : index
    %3 = vector.load %arg4[%c0_3, %c0_4] : memref<1x128xf32, #tpu.memory_space<vmem>>, vector<1x128xf32>
    %4 = vector.broadcast %3 : vector<1x128xf32> to vector<256x128xf32>
    %5 = arith.mulf %2, %4 : vector<256x128xf32>
    %c0_5 = arith.constant 0 : index
    %c0_6 = arith.constant 0 : index
    %6 = vector.load %arg5[%c0_5, %c0_6] : memref<1x128xf32, #tpu.memory_space<vmem>>, vector<1x128xf32>
    %7 = vector.broadcast %6 : vector<1x128xf32> to vector<256x128xf32>
    %8 = arith.addf %5, %7 : vector<256x128xf32>
    %cst_7 = arith.constant 0.000000e+00 : f32
    %9 = vector.broadcast %cst_7 : f32 to vector<256x128xf32>
    %10 = arith.maximumf %8, %9 : vector<256x128xf32>
    %11 = arith.truncf %10 : vector<256x128xf32> to vector<256x128xbf16>
    %c0_8 = arith.constant 0 : index
    %c0_9 = arith.constant 0 : index
    %12 = vector.load %arg6[%c0_8, %c0_9] : memref<256x128xbf16, #tpu.memory_space<vmem>>, vector<256x128xbf16>
    tpu.vector_store %arg6[%c0_8, %c0_9], %11 {strides = array<i32>} : memref<256x128xbf16, #tpu.memory_space<vmem>>, vector<256x128xbf16>,
    return
  }
  func.func @transform_0(%arg0: i32, %arg1: i32) -> (i32, i32) {
    %c0_i32 = arith.constant 0 : i32
    %c0_i32_0 = arith.constant 0 : i32
    return %arg0, %c0_i32 : i32, i32
  }
  func.func @transform_1(%arg0: i32, %arg1: i32) -> (i32, i32) {
    %c0_i32 = arith.constant 0 : i32
    %c0_i32_0 = arith.constant 0 : i32
    return %c0_i32, %arg1 : i32, i32
  }
  func.func @transform_2(%arg0: i32, %arg1: i32) -> (i32, i32) {
    %c0_i32 = arith.constant 0 : i32
    %c0_i32_0 = arith.constant 0 : i32
    return %c0_i32, %arg1 : i32, i32
  }
  func.func @transform_3(%arg0: i32, %arg1: i32) -> (i32, i32) {
    %c0_i32 = arith.constant 0 : i32
    %c0_i32_0 = arith.constant 0 : i32
    return %c0_i32, %arg1 : i32, i32
  }
  func.func @transform_4(%arg0: i32, %arg1: i32) -> (i32, i32) {
    %c0_i32 = arith.constant 0 : i32
    return %arg0, %arg1 : i32, i32
  }
}

</mosaic_0001>

<bundles_post_ra>
// kernel: tpu_custom_call.1
= control target key start
LH: loop header
LB: loop body
LE: loop exit
PB: predicated region body
PF: predicated region fallthrough
CT: control target
= control target key end

     0   :  { %9 = vsyncpa [#allocation3], 0  ;;  %s2197_s0 = inlined_call_operand.hbm [shape: bf16[2048,256], index: 0, kind: input, shape index: {}]   ;;  %s2198_s1 = inlined_call_operand.hbm [shape: bf16[256,128], index: 1, kind: input, shape index: {}]   ;;  %s2199_s2 = inlined_call_operand.vmem [shape: f32[1,128], index: 2, kind: input, shape index: {}]   ;;  %s2200_s3 = inlined_call_operand.vmem [shape: f32[1,128], index: 3, kind: input, shape index: {}]   ;;  %s2201_s4 = inlined_call_operand.hbm [shape: bf16[2048,128], index: 4, kind: output, shape index: {}]  }
   0x1   :  { %11 = vsyncpa [#allocation3 + $0x1], 0 }
   0x2   :  { %12 = vsyncpa [#allocation6], 0 }
   0x3   :  { %13 = vsyncpa [#allocation4], 0 }
   0x4   :  { %15 = vsyncpa [#allocation4 + $0x1], 0  ;;  %s1852_s15 = smov 0   ;;  %s1854_s16 = smov 0  }
   0x5   :  { %s1856_s17 = smov 0   ;;  %s1858_s18 = smov 0  }
   0x6   :  { %s1860_s19 = smov 0   ;;  %s1862_s20 = smov 0  }
   0x7 LB: > { %s1169_s21 = sadd.s32 4294967295, %s1816_s20   ;;  %s1170_s22 = sadd.s32 4294967294, %s1816_s20   ;;  %s1816_s20 = sphi %s1862_s20, %s21_s20   ;;  %s1812_s19 = sphi %s1860_s19, %s2224_s19   ;;  %s1808_s18 = sphi %s1858_s18, %s2223_s18   ;;  %s1804_s17 = sphi %s1856_s17, %s2222_s17   ;;  %s1800_s16 = sphi %s1854_s16, %s2221_s16   ;;  %s1796_s15 = sphi %s1852_s15, %s2220_s15  }
   0x8   : > { %p53_p0 = scmp.ne.s32.totalorder %s1800_s16, %s1796_s15  ;;  %p1886_p1 = scmp.eq.s32.totalorder %s1169_s21, 0 }
   0x9   : > { %p1890_p2 = scmp.eq.s32.totalorder %s1169_s21, 7  ;;  %p163_p3 = scmp.eq.s32.totalorder %s1170_s22, 7 }
   0xa   : > { %s2206_s23 = scalar_select %p1886_p1, 1, 0 }
   0xb   : > { %s2207_s24 = scalar_select %p1890_p2, 1, 0 }
   0xc   : > { %p1896_p4 = por %p1886_p1, %p53_p0  ;;  %p1171_p5 = scmp.ge.s32.totalorder %s1816_s20, 1 }
   0xd   : > { %p1901_p6 = por %p163_p3, %p53_p0  ;;  %p170_p7 = scmp.lt.s32.totalorder %s1816_s20, 9 }
   0xe   : > { %s2208_s25 = scalar_select %p1896_p4, 1, 0 }
   0xf   : > { %s2209_s26 = scalar_select %p1901_p6, 1, 0 }
  0x10   : > { %p1906_p8 = pnand %p1171_p5, %p170_p7  ;;  %s1818_s28 = smov [#allocation5]  }
  0x11   : > { %s184_s29 = sshll.u32 %s1818_s28, 4  ;;  %s33_s5 = sadd.s32 1, %s1812_s19  ;;  %s185_s29 = int_to_ptr.vmem [resolvable:$true] %s184_s29 }
  0x12   : > { %s2210_s27 = scalar_select %p1906_p8, 1, 0 }
  0x13   : > { %p1537_p9 = pneg %p1906_p8  ;;  %s1672_s8 = scalar_lea.hbm %s2198_s1, 2048 }
  0x14   : > { %p1673_p11 = scmp.ne.s32.totalorder %s2198_s1, %s1672_s8  ;;  %p1679_p3 = scmp.lt.u32.totalorder %s1672_s8, %s2198_s1 }
  0x15   : > { %p1914_p10 = pnand %p1537_p9, %p1886_p1 }
  0x17   : > { %p1674_p12 = pneg %p1914_p10 }
  0x19   : > { %p1675_p13 = pnand %p1674_p12, %p1673_p11 }
  0x1b   : > { %p1676_p0 = pneg %p1675_p13 }
  0x1d   : > { %p1681_p5 = pnand %p1679_p3, %p1676_p0 }
  0x1f   : > { %1684 = shalt.err (!%p1681_p5)
}
  0x20   : > { %s1685_s13 = scalar_lea.vmem %s185_s29, 2048  ;;  %p1693_p1 = scmp.lt.s32.totalorder %s185_s29, %s185_s29 }
  0x21   : > { %p1686_p7 = scmp.ne.s32.totalorder %s185_s29, %s1685_s13  ;;  %p1694_p4 = scmp.lt.s32.totalorder %s1685_s13, %s1685_s13 }
  0x23   : > { %p1688_p9 = pnand %p1686_p7, %p1674_p12  ;;  %p1695_p8 = por %p1694_p4, %p1693_p1 }
  0x25   : > { %p1689_p6 = pneg %p1688_p9 }
  0x27   : > { %p1696_p2 = pnand %p1695_p8, %p1689_p6 }
  0x29   : > { %1699 = shalt.err (!%p1696_p2)
}
  0x2a   : > { %s1819_s14 = smov 64   ;;  %s1820_s21 = smov 4  }
  0x2b   : > { %1540 = dma.hbm_to_vmem [thread:$0]  (!%p1914_p10), %s2198_s1, 2048, %s185_s29, [#allocation6], %s1819_s14, %s1819_s14, %s1820_s21  }
  0x2c   : > { %p35_p1 = scmp.ge.s32.totalorder %s33_s5, 8  ;;  %s40_s6 = sadd.s32 1, %s1804_s17 }
  0x2d   : > { %p47_p2 = scmp.ne.s32.totalorder %s1804_s17, %s1800_s16  ;;  %p48_p4 = scmp.eq.s32.totalorder %s1816_s20, 0 }
  0x2e   : > { %s2226_s5 = smov (%p35_p1, %s33_s5), 0  ;;  %p2213_p8 = scmp.ne.s32.totalorder %s2207_s24, 0 }
  0x2f   : > { %p1941_p6 = por %p48_p4, %p47_p2  ;;  %s37_s30 = ssub.s32 %s1812_s19, %s2226_s5 }
  0x30   : > { %p1947_p11 = por %p2213_p8, %p47_p2  ;;  %p1550_p12 = scmp.lt.s32.totalorder %s1816_s20, 8 }
  0x31   : > { %p38_p10 = scmp.eq.s32.totalorder %s37_s30, 0  ;;  %s210_s29 = sand.u32 1, %s1804_s17  }
  0x32   : > { %s1176_s9 = sshll.u32 %s210_s29, 8  ;;  %s1272_s11 = sshll.u32 %s1812_s19, 12 }
  0x33   : > { %s1956_s10 = scalar_select %p38_p10, %s1804_s17, %s40_s6  }
  0x34   : > { %s1962_s14 = scalar_lea.hbm %s2197_s0, %s1272_s11  ;;  %s214_s24 = scalar_lea.vmem [#allocation2], %s1176_s9 }
  0x35   : > { %s222_s21 = sshll.u32 %s214_s24, 4  ;;  %p1968_p13 = pnand %p1550_p12, %p1941_p6  ;;  %s1964_s21 = int_to_ptr.vmem [resolvable:$true] %s222_s21 }
  0x36   : > { %s1972_s28 = scalar_lea.sflag [#allocation3], %s210_s29  ;;  %s1700_s6 = scalar_lea.hbm %s1962_s14, 4096 }
  0x37   : > { %p1701_p0 = scmp.ne.s32.totalorder %s1962_s14, %s1700_s6  ;;  %p1702_p3 = pneg %p1968_p13 }
  0x38   : > { %s1705_s7 = scalar_lea.hbm %s2197_s0, 32768  ;;  %p1706_p9 = scmp.lt.u32.totalorder %s1962_s14, %s2197_s0 }
  0x39   : > { %p1703_p5 = pnand %p1702_p3, %p1701_p0  ;;  %p1707_p1 = scmp.lt.u32.totalorder %s1705_s7, %s1700_s6 }
  0x3a   : > { %p1709_p4 = scmp.lt.u32.totalorder %s1700_s6, %s1962_s14 }
  0x3b   : > { %p1704_p7 = pneg %p1703_p5  ;;  %p1708_p2 = por %p1707_p1, %p1706_p9 }
  0x3d   : > { %p1710_p6 = por %p1709_p4, %p1708_p2 }
  0x3f   : > { %p1711_p8 = pnand %p1710_p6, %p1704_p7 }
  0x41   : > { %1714 = shalt.err (!%p1711_p8)
}
  0x42   : > { %s1715_s29 = scalar_lea.vmem %s1964_s21, 4096  ;;  %s1821_s13 = smov [#allocation2]  }
  0x43   : > { %p1716_p12 = scmp.ne.s32.totalorder %s1964_s21, %s1715_s29  ;;  %s1720_s24 = sshll.u32 %s1821_s13, 4  ;;  %s1721_s24 = int_to_ptr.vmem [resolvable:$false] %s1720_s24 }
  0x44   : > { %s1722_s30 = scalar_lea.vmem %s1721_s24, 8192  ;;  %p1723_p5 = scmp.lt.s32.totalorder %s1964_s21, %s1721_s24 }
  0x45   : > { %p1718_p10 = pnand %p1716_p12, %p1702_p3  ;;  %p1724_p9 = scmp.lt.s32.totalorder %s1722_s30, %s1715_s29 }
  0x47   : > { %p1719_p0 = pneg %p1718_p10  ;;  %p1725_p1 = por %p1724_p9, %p1723_p5 }
  0x49   : > { %p1726_p2 = pnand %p1725_p1, %p1719_p0 }
  0x4b   : > { %1729 = shalt.err (!%p1726_p2)
}
  0x4c   : > { %s1822_s6 = smov 128   ;;  %s1823_s9 = smov 8  }
  0x4d   : > { %1544 = dma.hbm_to_vmem [thread:$0]  (!%p1968_p13), %s1962_s14, 4096, %s1964_s21, %s1972_s28, %s1822_s6, %s1822_s6, %s1823_s9  }
  0x4e   : > { %p2216_p3 = scmp.ne.s32.totalorder %s2210_s27, 0 }
  0x4f   : > { %s2003_s7 = sand.u32 (!%p2216_p3), 1, %s1800_s16   ;;  %p2217_p7 = scmp.ne.s32.totalorder (!%p2216_p3), %s2208_s25, 0 }
  0x50   : > { %234 = sbr.rel (%p2216_p3) target bundleno = 421 (0x1a5), region = 36  ;;  %s1181_s11 = sshll.u32 (!%p2216_p3), %s2003_s7, 8 }
  0x51   : > { %s237_s12 = scalar_lea.sflag (!%p2216_p3), [#allocation3], %s2003_s7  ;;  %s2007_s29 = scalar_lea.vmem (!%p2216_p3), [#allocation2], %s1181_s11 }
  0x57   : > { %1783 = dma.done.wait (%p2217_p7), %s237_s12, 4096  }
  0x58   : > { %1785 = vsyncadd (%p2217_p7), %s237_s12, 4294963200  ;;  %p2218_p13 = scmp.ne.s32.totalorder %s2206_s23, 0 }
  0x5a   : > { %1787 = dma.done.wait (%p2218_p13), [#allocation6], 2048  }
  0x5b   : > { %1789 = vsyncadd (%p2218_p13), [#allocation6], 4294965248  ;;  %v1608_v0 = vld [vmem:[#allocation5 + $0x40] sm:$0xff]   ;;  %v1610_v2 = vld [vmem:[#allocation5 + $0x48] sm:$0xff]   ;;  %s1183_s21 = sshll.u32 %s2003_s7, 7  ;;  %s1305_s28 = sshll.u32 %s1808_s18, 11 }
  0x5c   : > { %v1609_v1 = vld [vmem:[#allocation5] sm:$0xff]   ;;  %1401 = vmatprep.subr.bf16.mxu0 %v1608_v0  ;;  %1513 = vmatprep.subr.bf16.mxu1 %v1608_v0  ;;  %v1611_v3 = vld [vmem:[#allocation5 + $0x8] sm:$0xff]   ;;  %v1612_v4 = vld [vmem:[#allocation5 + $0x50] sm:$0xff]   ;;  %s2070_s22 = scalar_lea.vmem [#allocation7], %s1183_s21  ;;  %s2145_s6 = scalar_lea.hbm %s2201_s4, %s1305_s28 }
  0x5d   : > { %1402 = vmatpush3.bf16.msra.mxu0 %v1609_v1  ;;  %1521 = vmatpush3.bf16.msra.mxu1 %v1609_v1  ;;  %v1613_v5 = vld [vmem:[#allocation5 + $0x10] sm:$0xff]   ;;  %v1614_v6 = vld [vmem:[#allocation5 + $0x58] sm:$0xff]   ;;  %v1616_v8 = vld [vmem:[#allocation5 + $0x60] sm:$0xff]   ;;  %s1050_s13 = sshll.u32 %s2070_s22, 4  ;;  %s1036_s18 = scalar_lea.sflag [#allocation4], %s2003_s7  ;;  %s2147_s13 = int_to_ptr.vmem [resolvable:$true] %s1050_s13 }
  0x5e   : > { %1403 = vmatprep.subr.bf16.mxu0 %v1610_v2  ;;  %1514 = vmatprep.subr.bf16.mxu1 %v1610_v2  ;;  %v1615_v7 = vld [vmem:[#allocation5 + $0x18] sm:$0xff]   ;;  %v1617_v9 = vld [vmem:[#allocation5 + $0x20] sm:$0xff]   ;;  %v1618_v10 = vld [vmem:[#allocation5 + $0x68] sm:$0xff]   ;;  %s1730_s9 = scalar_lea.vmem %s2147_s13, 2048  ;;  %s1824_s11 = smov [#allocation7]  }
  0x5f   : > { %v1626_v11 = vld [vmem:[%s2007_s29 + $0x4] ss:$8 sps:$4 sm:$0xff]   ;;  %v1620_v14 = vld [vmem:[#allocation5 + $0x70] sm:$0xff]   ;;  %v1622_v16 = vld [vmem:[#allocation5 + $0x78] sm:$0xff]   ;;  %p1731_p4 = scmp.ne.s32.totalorder %s2147_s13, %s1730_s9  ;;  %s1734_s12 = sshll.u32 %s1824_s11, 4  ;;  %s1735_s12 = int_to_ptr.vmem [resolvable:$false] %s1734_s12 }
  0x60   : > { %v1629_v12 = vld [vmem:[%s2007_s29 + $0x84] ss:$8 sps:$4 sm:$0xff]   ;;  %636 = vmatprep.mubr.bf16.mxu0 %v1626_v11  ;;  %v1621_v15 = vld [vmem:[#allocation5 + $0x30] sm:$0xff]   ;;  %v1623_v17 = vld [vmem:[#allocation5 + $0x38] sm:$0xff]   ;;  %p1737_p12 = scmp.lt.s32.totalorder %s2147_s13, %s1735_s12 }
  0x61   : > { %1404 = vmatpush3.bf16.msra.mxu0 %v1611_v3  ;;  %1522 = vmatpush3.bf16.msra.mxu1 %v1611_v3  ;;  %v1619_v13 = vld [vmem:[#allocation5 + $0x28] sm:$0xff]   ;;  %v1630_v20 = vld [vmem:[%s2007_s29 + $0x14] ss:$8 sps:$4 sm:$0xff]   ;;  %v1634_v22 = vld [vmem:[%s2007_s29 + $0x10] ss:$8 sps:$4 sm:$0xff]   ;;  %p1732_p6 = pnand %p1731_p4, %p1947_p11 }
  0x62   : > { %1405 = vmatprep.subr.bf16.mxu0 %v1612_v4  ;;  %1515 = vmatprep.subr.bf16.mxu1 %v1612_v4  ;;  %v1624_v18 = vld [vmem:[%s2007_s29] ss:$8 sps:$4 sm:$0xff]   ;;  %v1632_v21 = vld [vmem:[%s2007_s29 + $0x94] ss:$8 sps:$4 sm:$0xff]   ;;  %v1635_v23 = vld [vmem:[%s2007_s29 + $0x90] ss:$8 sps:$4 sm:$0xff]  }
  0x63   : > { %700 = vmatprep.mubr.bf16.mxu1 %v1629_v12  ;;  %v1627_v19 = vld [vmem:[%s2007_s29 + $0x80] ss:$8 sps:$4 sm:$0xff]   ;;  %v1636_v24 = vld [vmem:[%s2007_s29 + $0x24] ss:$8 sps:$4 sm:$0xff]   ;;  %v1642_v28 = vld [vmem:[%s2007_s29 + $0x34] ss:$8 sps:$4 sm:$0xff]   ;;  %p1733_p8 = pneg %p1732_p6 }
  0x64   : > { %v1638_v25 = vld [vmem:[%s2007_s29 + $0xa4] ss:$8 sps:$4 sm:$0xff]   ;;  %v1640_v26 = vld [vmem:[%s2007_s29 + $0x20] ss:$8 sps:$4 sm:$0xff]   ;;  %v1644_v29 = vld [vmem:[%s2007_s29 + $0xb4] ss:$8 sps:$4 sm:$0xff]  }
  0x65   : > { %1406 = vmatpush3.bf16.msra.mxu0 %v1613_v5  ;;  %1523 = vmatpush3.bf16.msra.mxu1 %v1613_v5  ;;  %v1641_v27 = vld [vmem:[%s2007_s29 + $0xa0] ss:$8 sps:$4 sm:$0xff]   ;;  %v1646_v30 = vld [vmem:[%s2007_s29 + $0x30] ss:$8 sps:$4 sm:$0xff]   ;;  %v1648_v32 = vld [vmem:[%s2007_s29 + $0x44] ss:$8 sps:$4 sm:$0xff]  }
  0x66   : > { %1407 = vmatprep.subr.bf16.mxu0 %v1614_v6  ;;  %1516 = vmatprep.subr.bf16.mxu1 %v1614_v6  ;;  %v1647_v31 = vld [vmem:[%s2007_s29 + $0xb0] ss:$8 sps:$4 sm:$0xff]   ;;  %v1650_v33 = vld [vmem:[%s2007_s29 + $0xc4] ss:$8 sps:$4 sm:$0xff]   ;;  %v1652_v34 = vld [vmem:[%s2007_s29 + $0x40] ss:$8 sps:$4 sm:$0xff]  }
  0x67   : > { %v1653_v35 = vld [vmem:[%s2007_s29 + $0xc0] ss:$8 sps:$4 sm:$0xff]   ;;  %v1654_v36 = vld [vmem:[%s2007_s29 + $0x54] ss:$8 sps:$4 sm:$0xff]   ;;  %v1658_v38 = vld [vmem:[%s2007_s29 + $0x50] ss:$8 sps:$4 sm:$0xff]  }
  0x68   : > { %v1656_v37 = vld [vmem:[%s2007_s29 + $0xd4] ss:$8 sps:$4 sm:$0xff]   ;;  %v1659_v39 = vld [vmem:[%s2007_s29 + $0xd0] ss:$8 sps:$4 sm:$0xff]   ;;  %v1660_v40 = vld [vmem:[%s2007_s29 + $0x64] ss:$8 sps:$4 sm:$0xff]  }
  0x69   : > { %1408 = vmatpush3.bf16.msra.mxu0 %v1615_v7  ;;  %1524 = vmatpush3.bf16.msra.mxu1 %v1615_v7  ;;  %v1662_v41 = vld [vmem:[%s2007_s29 + $0xe4] ss:$8 sps:$4 sm:$0xff]   ;;  %v1664_v42 = vld [vmem:[%s2007_s29 + $0x60] ss:$8 sps:$4 sm:$0xff]   ;;  %v1666_v44 = vld [vmem:[%s2007_s29 + $0x74] ss:$8 sps:$4 sm:$0xff]  }
  0x6a   : > { %1409 = vmatprep.subr.bf16.mxu0 %v1616_v8  ;;  %1517 = vmatprep.subr.bf16.mxu1 %v1616_v8  ;;  %v1665_v43 = vld [vmem:[%s2007_s29 + $0xe0] ss:$8 sps:$4 sm:$0xff]   ;;  %v1668_v45 = vld [vmem:[%s2007_s29 + $0xf4] ss:$8 sps:$4 sm:$0xff]   ;;  %v1670_v46 = vld [vmem:[%s2007_s29 + $0x70] ss:$8 sps:$4 sm:$0xff]  }
  0x6b   : > { %v1671_v47 = vld [vmem:[%s2007_s29 + $0xf0] ss:$8 sps:$4 sm:$0xff]   ;;  %v2052_v51 = vld [vmem:[%s2199_s2] ss:$0 sm:$0xff]  ;;  %s1736_s29 = scalar_lea.vmem %s1735_s12, 4096 }
  0x6c   : > { %v2057_v57 = vld [vmem:[%s2200_s3] ss:$0 sm:$0xff]  ;;  %p1738_p10 = scmp.lt.s32.totalorder %s1736_s29, %s1730_s9 }
  0x6d   : > { %1410 = vmatpush3.bf16.msra.mxu0 %v1617_v9  ;;  %1525 = vmatpush3.bf16.msra.mxu1 %v1617_v9 }
  0x6e   : > { %1411 = vmatprep.subr.bf16.mxu0 %v1618_v10  ;;  %1518 = vmatprep.subr.bf16.mxu1 %v1618_v10  ;;  %p1739_p0 = por %p1738_p10, %p1737_p12 }
  0x70   : > { %p1740_p5 = pnand %p1739_p0, %p1733_p8 }
  0x71   : > { %1412 = vmatpush3.bf16.msra.mxu0 %v1619_v13  ;;  %1526 = vmatpush3.bf16.msra.mxu1 %v1619_v13 }
  0x72   : > { %1413 = vmatprep.subr.bf16.mxu0 %v1620_v14  ;;  %1519 = vmatprep.subr.bf16.mxu1 %v1620_v14 }
  0x75   : > { %1414 = vmatpush3.bf16.msra.mxu0 %v1621_v15  ;;  %1527 = vmatpush3.bf16.msra.mxu1 %v1621_v15 }
  0x76   : > { %1415 = vmatprep.subr.bf16.mxu0 %v1622_v16  ;;  %1520 = vmatprep.subr.bf16.mxu1 %v1622_v16 }
  0x79   : > { %1416 = vmatpush3.bf16.msra.mxu0 %v1623_v17  ;;  %1528 = vmatpush3.bf16.msra.mxu1 %v1623_v17 }
  0x7c   : > { %637 = vmatmul.mubr.bf16.vlgmr.msra.gmra.mrb[0].mxu0 %v1624_v18  ;;  %701 = vmatmul.mubr.bf16.vlgmr.msra.gmra.mrb[0].mxu1 %v1627_v19 }
  0x7d   : > { %644 = vmatprep.mubr.bf16.mxu0 %v1630_v20  ;;  %708 = vmatprep.mubr.bf16.mxu1 %v1632_v21 }
  0x84   : > { %645 = vmatmul.mubr.bf16.gmra.mrb[4].mxu0 %v1634_v22  ;;  %709 = vmatmul.mubr.bf16.gmra.mrb[4].mxu1 %v1635_v23 }
  0x85   : > { %652 = vmatprep.mubr.bf16.mxu0 %v1636_v24  ;;  %716 = vmatprep.mubr.bf16.mxu1 %v1638_v25 }
  0x8c   : > { %653 = vmatmul.mubr.bf16.gmra.mrb[8].mxu0 %v1640_v26  ;;  %717 = vmatmul.mubr.bf16.gmra.mrb[8].mxu1 %v1641_v27 }
  0x8d   : > { %660 = vmatprep.mubr.bf16.mxu0 %v1642_v28  ;;  %724 = vmatprep.mubr.bf16.mxu1 %v1644_v29 }
  0x94   : > { %661 = vmatmul.mubr.bf16.gmra.mrb[12].mxu0 %v1646_v30  ;;  %725 = vmatmul.mubr.bf16.gmra.mrb[12].mxu1 %v1647_v31 }
  0x95   : > { %668 = vmatprep.mubr.bf16.mxu0 %v1648_v32  ;;  %732 = vmatprep.mubr.bf16.mxu1 %v1650_v33 }
  0x9c   : > { %669 = vmatmul.mubr.bf16.gmra.mrb[16].mxu0 %v1652_v34  ;;  %733 = vmatmul.mubr.bf16.gmra.mrb[16].mxu1 %v1653_v35 }
  0x9d   : > { %676 = vmatprep.mubr.bf16.mxu0 %v1654_v36  ;;  %740 = vmatprep.mubr.bf16.mxu1 %v1656_v37 }
  0xa4   : > { %677 = vmatmul.mubr.bf16.gmra.mrb[20].mxu0 %v1658_v38  ;;  %741 = vmatmul.mubr.bf16.gmra.mrb[20].mxu1 %v1659_v39 }
  0xa5   : > { %684 = vmatprep.mubr.bf16.mxu0 %v1660_v40  ;;  %748 = vmatprep.mubr.bf16.mxu1 %v1662_v41 }
  0xac   : > { %685 = vmatmul.mubr.bf16.gmra.mrb[24].mxu0 %v1664_v42  ;;  %749 = vmatmul.mubr.bf16.gmra.mrb[24].mxu1 %v1665_v43 }
  0xad   : > { %692 = vmatprep.mubr.bf16.mxu0 %v1666_v44  ;;  %756 = vmatprep.mubr.bf16.mxu1 %v1668_v45 }
  0xb4   : > { %693 = vmatmul.mubr.bf16.gmra.mrb[28].mxu0 %v1670_v46  ;;  %757 = vmatmul.mubr.bf16.gmra.mrb[28].mxu1 %v1671_v47 }
 0x14f   : > { %v1417_v48 = vpop.f32.mrb[0].mxu0  ;;  %v1465_v49 = vpop.f32.mrb[0].mxu1 }
 0x150   : > { %v1418_v50 = vpop.f32.mrb[1].mxu0  ;;  %v1466_v52 = vpop.f32.mrb[1].mxu1 }
 0x151   : > { %v1419_v53 = vadd.f32 %v1418_v50, %v1417_v48  ;;  %v1467_v54 = vadd.f32 %v1466_v52, %v1465_v49  ;;  %v1420_v55 = vpop.f32.mrb[2].mxu0  ;;  %v1468_v56 = vpop.f32.mrb[2].mxu1 }
 0x152   : > { %v1421_v58 = vpop.f32.mrb[3].mxu0  ;;  %v1469_v59 = vpop.f32.mrb[3].mxu1 }
 0x153   : > { %v772_v60 = vmul.f32 %v1419_v53, %v2052_v51  ;;  %v788_v61 = vmul.f32 %v1467_v54, %v2052_v51  ;;  %v1422_v62 = vadd.f32 %v1421_v58, %v1420_v55  ;;  %v1470_v63 = vadd.f32 %v1469_v59, %v1468_v56 }
 0x155   : > { %v811_v0 = vadd.f32 %v2057_v57, %v772_v60  ;;  %v827_v1 = vadd.f32 %v2057_v57, %v788_v61  ;;  %v773_v2 = vmul.f32 %v1422_v62, %v2052_v51  ;;  %v789_v3 = vmul.f32 %v1470_v63, %v2052_v51 }
 0x157   : > { %v812_v4 = vadd.f32 %v2057_v57, %v773_v2  ;;  %v828_v5 = vadd.f32 %v2057_v57, %v789_v3  ;;  %v1423_v6 = vpop.f32.mrb[4].mxu0  ;;  %v1471_v7 = vpop.f32.mrb[4].mxu1  ;;  %v843_v8 = vmax.f32 %v811_v0, 0.0  ;;  %v859_v9 = vmax.f32 %v827_v1, 0.0 }
 0x158   : > { %v1424_v10 = vpop.f32.mrb[5].mxu0  ;;  %v1472_v11 = vpop.f32.mrb[5].mxu1 }
 0x159   : > { %v844_v12 = vmax.f32 %v812_v4, 0.0  ;;  %v860_v13 = vmax.f32 %v828_v5, 0.0  ;;  %v1425_v14 = vadd.f32 %v1424_v10, %v1423_v6  ;;  %v1473_v15 = vadd.f32 %v1472_v11, %v1471_v7  ;;  %v1426_v16 = vpop.f32.mrb[6].mxu0  ;;  %v1474_v17 = vpop.f32.mrb[6].mxu1 }
 0x15a   : > { %v1427_v18 = vpop.f32.mrb[7].mxu0  ;;  %v1475_v19 = vpop.f32.mrb[7].mxu1 }
 0x15b   : > { %v1309_v20 = vpack.c.bf16 %v844_v12, %v843_v8  ;;  %v1349_v21 = vpack.c.bf16 %v860_v13, %v859_v9  ;;  %v774_v22 = vmul.f32 %v1425_v14, %v2052_v51  ;;  %v790_v23 = vmul.f32 %v1473_v15, %v2052_v51 }
 0x15c   : > { %v1428_v24 = vadd.f32 %v1427_v18, %v1426_v16  ;;  %v1476_v25 = vadd.f32 %v1475_v19, %v1474_v17 }
 0x15d   : > { %1310 = vst [vmem:[%s2070_s22] sm:$0xff] %v1309_v20   ;;  %1393 = vst [vmem:[%s2070_s22 + $0x40] sm:$0xff] %v1349_v21   ;;  %v813_v26 = vadd.f32 %v2057_v57, %v774_v22  ;;  %v829_v27 = vadd.f32 %v2057_v57, %v790_v23 }
 0x15e   : > { %v775_v28 = vmul.f32 %v1428_v24, %v2052_v51  ;;  %v791_v29 = vmul.f32 %v1476_v25, %v2052_v51 }
 0x15f   : > { %v1429_v30 = vpop.f32.mrb[8].mxu0  ;;  %v1477_v31 = vpop.f32.mrb[8].mxu1  ;;  %v845_v40 = vmax.f32 %v813_v26, 0.0  ;;  %v861_v41 = vmax.f32 %v829_v27, 0.0 }
 0x160   : > { %v814_v32 = vadd.f32 %v2057_v57, %v775_v28  ;;  %v830_v33 = vadd.f32 %v2057_v57, %v791_v29  ;;  %v1430_v34 = vpop.f32.mrb[9].mxu0  ;;  %v1478_v35 = vpop.f32.mrb[9].mxu1 }
 0x161   : > { %v1431_v36 = vadd.f32 %v1430_v34, %v1429_v30  ;;  %v1479_v37 = vadd.f32 %v1478_v35, %v1477_v31  ;;  %v1432_v38 = vpop.f32.mrb[10].mxu0  ;;  %v1480_v39 = vpop.f32.mrb[10].mxu1 }
 0x162   : > { %v846_v42 = vmax.f32 %v814_v32, 0.0  ;;  %v862_v43 = vmax.f32 %v830_v33, 0.0  ;;  %v1433_v44 = vpop.f32.mrb[11].mxu0  ;;  %v1481_v45 = vpop.f32.mrb[11].mxu1 }
 0x163   : > { %v776_v46 = vmul.f32 %v1431_v36, %v2052_v51  ;;  %v792_v47 = vmul.f32 %v1479_v37, %v2052_v51  ;;  %v1434_v48 = vadd.f32 %v1433_v44, %v1432_v38  ;;  %v1482_v49 = vadd.f32 %v1481_v45, %v1480_v39 }
 0x164   : > { %v1314_v50 = vpack.c.bf16 %v846_v42, %v845_v40  ;;  %v1354_v52 = vpack.c.bf16 %v862_v43, %v861_v41 }
 0x165   : > { %v815_v53 = vadd.f32 %v2057_v57, %v776_v46  ;;  %v831_v54 = vadd.f32 %v2057_v57, %v792_v47  ;;  %v777_v55 = vmul.f32 %v1434_v48, %v2052_v51  ;;  %v793_v56 = vmul.f32 %v1482_v49, %v2052_v51 }
 0x166   : > { %1386 = vst [vmem:[%s2070_s22 + $0x8] sm:$0xff] %v1314_v50   ;;  %1394 = vst [vmem:[%s2070_s22 + $0x48] sm:$0xff] %v1354_v52  }
 0x167   : > { %v816_v58 = vadd.f32 %v2057_v57, %v777_v55  ;;  %v832_v59 = vadd.f32 %v2057_v57, %v793_v56  ;;  %v1435_v60 = vpop.f32.mrb[12].mxu0  ;;  %v1483_v61 = vpop.f32.mrb[12].mxu1  ;;  %v847_v62 = vmax.f32 %v815_v53, 0.0  ;;  %v863_v63 = vmax.f32 %v831_v54, 0.0 }
 0x168   : > { %v1436_v0 = vpop.f32.mrb[13].mxu0  ;;  %v1484_v1 = vpop.f32.mrb[13].mxu1 }
 0x169   : > { %v848_v2 = vmax.f32 %v816_v58, 0.0  ;;  %v864_v3 = vmax.f32 %v832_v59, 0.0  ;;  %v1437_v4 = vadd.f32 %v1436_v0, %v1435_v60  ;;  %v1485_v5 = vadd.f32 %v1484_v1, %v1483_v61  ;;  %v1438_v6 = vpop.f32.mrb[14].mxu0  ;;  %v1486_v7 = vpop.f32.mrb[14].mxu1 }
 0x16a   : > { %v1439_v8 = vpop.f32.mrb[15].mxu0  ;;  %v1487_v9 = vpop.f32.mrb[15].mxu1 }
 0x16b   : > { %v1319_v10 = vpack.c.bf16 %v848_v2, %v847_v62  ;;  %v1359_v11 = vpack.c.bf16 %v864_v3, %v863_v63  ;;  %v778_v12 = vmul.f32 %v1437_v4, %v2052_v51  ;;  %v794_v13 = vmul.f32 %v1485_v5, %v2052_v51 }
 0x16c   : > { %v1440_v14 = vadd.f32 %v1439_v8, %v1438_v6  ;;  %v1488_v15 = vadd.f32 %v1487_v9, %v1486_v7 }
 0x16d   : > { %1387 = vst [vmem:[%s2070_s22 + $0x10] sm:$0xff] %v1319_v10   ;;  %1395 = vst [vmem:[%s2070_s22 + $0x50] sm:$0xff] %v1359_v11   ;;  %v817_v16 = vadd.f32 %v2057_v57, %v778_v12  ;;  %v833_v17 = vadd.f32 %v2057_v57, %v794_v13 }
 0x16e   : > { %v779_v18 = vmul.f32 %v1440_v14, %v2052_v51  ;;  %v795_v19 = vmul.f32 %v1488_v15, %v2052_v51 }
 0x16f   : > { %v1441_v20 = vpop.f32.mrb[16].mxu0  ;;  %v1489_v21 = vpop.f32.mrb[16].mxu1  ;;  %v849_v30 = vmax.f32 %v817_v16, 0.0  ;;  %v865_v31 = vmax.f32 %v833_v17, 0.0 }
 0x170   : > { %v818_v22 = vadd.f32 %v2057_v57, %v779_v18  ;;  %v834_v23 = vadd.f32 %v2057_v57, %v795_v19  ;;  %v1442_v24 = vpop.f32.mrb[17].mxu0  ;;  %v1490_v25 = vpop.f32.mrb[17].mxu1 }
 0x171   : > { %v1443_v26 = vadd.f32 %v1442_v24, %v1441_v20  ;;  %v1491_v27 = vadd.f32 %v1490_v25, %v1489_v21  ;;  %v1444_v28 = vpop.f32.mrb[18].mxu0  ;;  %v1492_v29 = vpop.f32.mrb[18].mxu1 }
 0x172   : > { %v850_v32 = vmax.f32 %v818_v22, 0.0  ;;  %v866_v33 = vmax.f32 %v834_v23, 0.0  ;;  %v1445_v34 = vpop.f32.mrb[19].mxu0  ;;  %v1493_v35 = vpop.f32.mrb[19].mxu1 }
 0x173   : > { %v780_v36 = vmul.f32 %v1443_v26, %v2052_v51  ;;  %v796_v37 = vmul.f32 %v1491_v27, %v2052_v51  ;;  %v1446_v38 = vadd.f32 %v1445_v34, %v1444_v28  ;;  %v1494_v39 = vadd.f32 %v1493_v35, %v1492_v29 }
 0x174   : > { %v1324_v40 = vpack.c.bf16 %v850_v32, %v849_v30  ;;  %v1364_v41 = vpack.c.bf16 %v866_v33, %v865_v31 }
 0x175   : > { %v819_v42 = vadd.f32 %v2057_v57, %v780_v36  ;;  %v835_v43 = vadd.f32 %v2057_v57, %v796_v37  ;;  %v781_v44 = vmul.f32 %v1446_v38, %v2052_v51  ;;  %v797_v45 = vmul.f32 %v1494_v39, %v2052_v51 }
 0x176   : > { %1388 = vst [vmem:[%s2070_s22 + $0x18] sm:$0xff] %v1324_v40   ;;  %1396 = vst [vmem:[%s2070_s22 + $0x58] sm:$0xff] %v1364_v41  }
 0x177   : > { %v820_v46 = vadd.f32 %v2057_v57, %v781_v44  ;;  %v836_v47 = vadd.f32 %v2057_v57, %v797_v45  ;;  %v1447_v48 = vpop.f32.mrb[20].mxu0  ;;  %v1495_v49 = vpop.f32.mrb[20].mxu1  ;;  %v851_v50 = vmax.f32 %v819_v42, 0.0  ;;  %v867_v52 = vmax.f32 %v835_v43, 0.0 }
 0x178   : > { %v1448_v53 = vpop.f32.mrb[21].mxu0  ;;  %v1496_v54 = vpop.f32.mrb[21].mxu1 }
 0x179   : > { %v852_v55 = vmax.f32 %v820_v46, 0.0  ;;  %v868_v56 = vmax.f32 %v836_v47, 0.0  ;;  %v1449_v58 = vadd.f32 %v1448_v53, %v1447_v48  ;;  %v1497_v59 = vadd.f32 %v1496_v54, %v1495_v49  ;;  %v1450_v60 = vpop.f32.mrb[22].mxu0  ;;  %v1498_v61 = vpop.f32.mrb[22].mxu1 }
 0x17a   : > { %v1451_v62 = vpop.f32.mrb[23].mxu0  ;;  %v1499_v63 = vpop.f32.mrb[23].mxu1 }
 0x17b   : > { %v1329_v0 = vpack.c.bf16 %v852_v55, %v851_v50  ;;  %v1369_v1 = vpack.c.bf16 %v868_v56, %v867_v52  ;;  %v782_v2 = vmul.f32 %v1449_v58, %v2052_v51  ;;  %v798_v3 = vmul.f32 %v1497_v59, %v2052_v51 }
 0x17c   : > { %v1452_v4 = vadd.f32 %v1451_v62, %v1450_v60  ;;  %v1500_v5 = vadd.f32 %v1499_v63, %v1498_v61 }
 0x17d   : > { %1389 = vst [vmem:[%s2070_s22 + $0x20] sm:$0xff] %v1329_v0   ;;  %1397 = vst [vmem:[%s2070_s22 + $0x60] sm:$0xff] %v1369_v1   ;;  %v821_v6 = vadd.f32 %v2057_v57, %v782_v2  ;;  %v837_v7 = vadd.f32 %v2057_v57, %v798_v3 }
 0x17e   : > { %v783_v8 = vmul.f32 %v1452_v4, %v2052_v51  ;;  %v799_v9 = vmul.f32 %v1500_v5, %v2052_v51 }
 0x17f   : > { %v1453_v10 = vpop.f32.mrb[24].mxu0  ;;  %v1501_v11 = vpop.f32.mrb[24].mxu1  ;;  %v853_v20 = vmax.f32 %v821_v6, 0.0  ;;  %v869_v21 = vmax.f32 %v837_v7, 0.0 }
 0x180   : > { %v822_v12 = vadd.f32 %v2057_v57, %v783_v8  ;;  %v838_v13 = vadd.f32 %v2057_v57, %v799_v9  ;;  %v1454_v14 = vpop.f32.mrb[25].mxu0  ;;  %v1502_v15 = vpop.f32.mrb[25].mxu1 }
 0x181   : > { %v1455_v16 = vadd.f32 %v1454_v14, %v1453_v10  ;;  %v1503_v17 = vadd.f32 %v1502_v15, %v1501_v11  ;;  %v1456_v18 = vpop.f32.mrb[26].mxu0  ;;  %v1504_v19 = vpop.f32.mrb[26].mxu1 }
 0x182   : > { %v854_v22 = vmax.f32 %v822_v12, 0.0  ;;  %v870_v23 = vmax.f32 %v838_v13, 0.0  ;;  %v1457_v24 = vpop.f32.mrb[27].mxu0  ;;  %v1505_v25 = vpop.f32.mrb[27].mxu1 }
 0x183   : > { %v784_v26 = vmul.f32 %v1455_v16, %v2052_v51  ;;  %v800_v27 = vmul.f32 %v1503_v17, %v2052_v51  ;;  %v1458_v28 = vadd.f32 %v1457_v24, %v1456_v18  ;;  %v1506_v29 = vadd.f32 %v1505_v25, %v1504_v19 }
 0x184   : > { %v1334_v30 = vpack.c.bf16 %v854_v22, %v853_v20  ;;  %v1374_v31 = vpack.c.bf16 %v870_v23, %v869_v21 }
 0x185   : > { %v823_v32 = vadd.f32 %v2057_v57, %v784_v26  ;;  %v839_v33 = vadd.f32 %v2057_v57, %v800_v27  ;;  %v785_v34 = vmul.f32 %v1458_v28, %v2052_v51  ;;  %v801_v35 = vmul.f32 %v1506_v29, %v2052_v51 }
 0x186   : > { %1390 = vst [vmem:[%s2070_s22 + $0x28] sm:$0xff] %v1334_v30   ;;  %1398 = vst [vmem:[%s2070_s22 + $0x68] sm:$0xff] %v1374_v31  }
 0x187   : > { %v824_v36 = vadd.f32 %v2057_v57, %v785_v34  ;;  %v840_v37 = vadd.f32 %v2057_v57, %v801_v35  ;;  %v1459_v38 = vpop.f32.mrb[28].mxu0  ;;  %v1507_v39 = vpop.f32.mrb[28].mxu1  ;;  %v855_v40 = vmax.f32 %v823_v32, 0.0  ;;  %v871_v41 = vmax.f32 %v839_v33, 0.0 }
 0x188   : > { %v1460_v42 = vpop.f32.mrb[29].mxu0  ;;  %v1508_v43 = vpop.f32.mrb[29].mxu1 }
 0x189   : > { %v856_v44 = vmax.f32 %v824_v36, 0.0  ;;  %v872_v45 = vmax.f32 %v840_v37, 0.0  ;;  %v1461_v46 = vadd.f32 %v1460_v42, %v1459_v38  ;;  %v1509_v47 = vadd.f32 %v1508_v43, %v1507_v39  ;;  %v1462_v48 = vpop.f32.mrb[30].mxu0  ;;  %v1510_v49 = vpop.f32.mrb[30].mxu1 }
 0x18a   : > { %v1463_v50 = vpop.f32.mrb[31].mxu0  ;;  %v1511_v52 = vpop.f32.mrb[31].mxu1 }
 0x18b   : > { %v1339_v53 = vpack.c.bf16 %v856_v44, %v855_v40  ;;  %v1379_v54 = vpack.c.bf16 %v872_v45, %v871_v41  ;;  %v786_v55 = vmul.f32 %v1461_v46, %v2052_v51  ;;  %v802_v56 = vmul.f32 %v1509_v47, %v2052_v51 }
 0x18c   : > { %v1464_v58 = vadd.f32 %v1463_v50, %v1462_v48  ;;  %v1512_v59 = vadd.f32 %v1511_v52, %v1510_v49 }
 0x18d   : > { %1391 = vst [vmem:[%s2070_s22 + $0x30] sm:$0xff] %v1339_v53   ;;  %1399 = vst [vmem:[%s2070_s22 + $0x70] sm:$0xff] %v1379_v54   ;;  %v825_v60 = vadd.f32 %v2057_v57, %v786_v55  ;;  %v841_v61 = vadd.f32 %v2057_v57, %v802_v56 }
 0x18e   : > { %v787_v62 = vmul.f32 %v1464_v58, %v2052_v51  ;;  %v803_v63 = vmul.f32 %v1512_v59, %v2052_v51 }
 0x18f   : > { %v857_v2 = vmax.f32 %v825_v60, 0.0  ;;  %v873_v3 = vmax.f32 %v841_v61, 0.0 }
 0x190   : > { %v826_v0 = vadd.f32 %v2057_v57, %v787_v62  ;;  %v842_v1 = vadd.f32 %v2057_v57, %v803_v63 }
 0x192   : > { %v858_v4 = vmax.f32 %v826_v0, 0.0  ;;  %v874_v5 = vmax.f32 %v842_v1, 0.0 }
 0x194   : > { %v1344_v51 = vpack.c.bf16 %v858_v4, %v857_v2  ;;  %v1384_v6 = vpack.c.bf16 %v874_v5, %v873_v3 }
 0x196   : > { %1392 = vst [vmem:[%s2070_s22 + $0x38] sm:$0xff] %v1344_v51   ;;  %1400 = vst [vmem:[%s2070_s22 + $0x78] sm:$0xff] %v1384_v6  }
 0x197   : > { %1743 = shalt.err (!%p1740_p5)
}
 0x198   : > { %s1744_s23 = scalar_lea.hbm %s2145_s6, 2048  ;;  %s1748_s14 = scalar_lea.hbm %s2201_s4, 16384 }
 0x199   : > { %p1745_p9 = scmp.ne.s32.totalorder %s2145_s6, %s1744_s23  ;;  %p1749_p3 = scmp.lt.u32.totalorder %s2145_s6, %s2201_s4 }
 0x19a   : > { %p1750_p7 = scmp.lt.u32.totalorder %s1748_s14, %s1744_s23  ;;  %p1752_p4 = scmp.lt.u32.totalorder %s1744_s23, %s2145_s6 }
 0x19b   : > { %p1746_p1 = pnand %p1745_p9, %p1947_p11 }
 0x19c   : > { %p1751_p13 = por %p1750_p7, %p1749_p3 }
 0x19d   : > { %p1747_p2 = pneg %p1746_p1 }
 0x19e   : > { %p1753_p6 = por %p1752_p4, %p1751_p13 }
 0x1a0   : > { %p1754_p8 = pnand %p1753_p6, %p1747_p2 }
 0x1a2   : > { %1757 = shalt.err (!%p1754_p8)
}
 0x1a3   : > { %s1825_s28 = smov 64   ;;  %s1826_s24 = smov 4  }
 0x1a4   : > { %1535 = dma.vmem_to_hbm [thread:$0]  (%p1947_p11), %s2147_s13, 2048, %s2145_s6, %s1036_s18, %s1825_s28, %s1825_s28, %s1826_s24  }
 0x1a5 PF: > { %p1552_p12 = scmp.ge.s32.totalorder %s1816_s20, 2  ;;  %s1065_s30 = sand.u32 1, %s1796_s15  }
 0x1a6   : > { %p2219_p10 = scmp.ne.s32.totalorder %s2209_s26, 0  ;;  %s1066_s9 = scalar_lea.sflag [#allocation4], %s1065_s30 }
 0x1a8   : > { %p1546_p0 = pnand %p1552_p12, %p2219_p10 }
 0x1aa   : > { %1791 = dma.done.wait (!%p1546_p0), %s1066_s9, 2048  }
 0x1ab   : > { %1793 = vsyncadd (!%p1546_p0), %s1066_s9, 4294965248  ;;  %s21_s20 = sadd.s32 1, %s1816_s20   ;;  %s2220_s15 = smov %s1800_s16 }
 0x1ac   : > { %p18_p5 = scmp.ge.s32.totalorder %s21_s20, 10   ;;  %s2221_s16 = smov %s1804_s17 }
 0x1ad   : > { %s2222_s17 = smov %s1956_s10  ;;  %s2223_s18 = smov %s1812_s19 }
 0x1ae   : > { %s2224_s19 = smov %s2226_s5  ;;  %20 = sbr.rel (!%p18_p5) target bundleno = 7 (0x7), region = 92 }
 0x1b5   :  { %1071 = vsyncpa [#allocation3], 1 }
 0x1b6   :  { %1073 = vsyncpa [#allocation3 + $0x1], 1 }
 0x1b7   :  { %1074 = vsyncpa [#allocation6], 1 }
 0x1b8   :  { %1075 = vsyncpa [#allocation4], 1 }
 0x1b9   :  { %1077 = vsyncpa [#allocation4 + $0x1], 1 }

</bundles_post_ra>
